<compile_context>
chip_gen: v5e
topology: v5e:2x2
jax: 0.10.0
libtpu: 0.0.40
codegen_flags: <defaults>
</compile_context>

<pallas_src>
import functools

import jax
import jax.numpy as jnp
from jax.experimental import pallas as pl
from jax.experimental.pallas import tpu as pltpu


def _round_up(x, m):
    return (x + m - 1) // m * m


def _mlp_kernel(x_ref, w1_ref, b1_ref, w2_ref, b2_ref, o_ref, acc_ref):
    h_id = pl.program_id(1)

    @pl.when(h_id == 0)
    def _():
        acc_ref[...] = jnp.zeros_like(acc_ref)

    # fc1 partial over this hidden tile: native-dtype MXU feed, f32 accumulate.
    h = jnp.dot(x_ref[...], w1_ref[...], preferred_element_type=jnp.float32)
    # b1 is fully VMEM-resident as (n_hidden_tiles, th); row h_id is this tile's
    # bias slice (no per-step bias DMA).
    h = h + b1_ref[pl.ds(h_id, 1), :].astype(jnp.float32)

    # exact (erf) GELU, matching torch.nn.GELU() default numerics.
    h = 0.5 * h * (1.0 + jax.lax.erf(h * jnp.float32(0.7071067811865476)))

    # drop1: p = 0.0 -> identity.

    # fc2 partial: feed the MXU in the weight dtype, accumulate in f32 scratch.
    acc_ref[...] += jnp.dot(h.astype(w2_ref.dtype), w2_ref[...],
                            preferred_element_type=jnp.float32)

    @pl.when(h_id == pl.num_programs(1) - 1)
    def _():
        # b2 added exactly once, on the final hidden step.
        o_ref[...] = (acc_ref[...] + b2_ref[...].astype(jnp.float32)
                      ).astype(o_ref.dtype)

    # drop2: p = 0.0 -> identity.


@functools.partial(jax.jit, static_argnames=("tm", "th", "lane_align"))
def mlp_pallas(x, w1, b1, w2, b2, *, tm=None, th=None, lane_align=128):
    """x: [B, S, C_in]; w1: [C_in, H]; b1: [H]; w2: [H, C_out]; b2: [C_out]."""
    B, S, C_in = x.shape
    H = w1.shape[1]
    C_out = w2.shape[1]
    N = B * S

    x_it = jnp.dtype(x.dtype).itemsize
    w_it = jnp.dtype(w1.dtype).itemsize
    o_it = x_it
    # Sublane packing of the row (second-to-last) dim depends on dtype width:
    # 8 for f32, 16 for bf16, 32 for int8/fp8.
    sub = max(8, 32 // x_it)

    # Chip VMEM capacity drives tile defaults and the pipeline byte budget.
    try:
        vmem_cap = int(pltpu.get_tpu_info().vmem_capacity_bytes)
    except Exception:  # conservative fallback (v7x per-TC VMEM)
        vmem_cap = 64 * 1024 * 1024

    if tm is None:
        tm = 1024 if vmem_cap >= (96 << 20) else 512   # v5e/v6e: 1024, v7x: 512
    if th is None:
        th = 1024 if vmem_cap >= (96 << 20) else 512

    # Lane-dense channel padding (pass lane_align=256 on v6e/v7x when channel
    # dims would otherwise land on an odd multiple of 128, to keep the
    # 2x256x256 MXU full-width).
    c_in_p = _round_up(C_in, lane_align)
    c_out_p = _round_up(C_out, lane_align)

    tm = _round_up(tm, sub)
    th = _round_up(th, 128)
    tm_eff = min(tm, _round_up(N, sub))
    th_eff = min(th, _round_up(H, 128))

    # Megacore: give the parallel row axis >= 2 tiles when there is enough work
    # so both v7x TensorCores are fed.
    if _round_up(N, tm_eff) // tm_eff < 2 and N >= 512:
        tm_eff = _round_up((N + 1) // 2, sub)

    # ---- VMEM budget: double-buffered pipeline blocks + f32 accumulator ----
    budget = int(vmem_cap * 0.70)  # leave headroom for Mosaic internal scratch

    def vmem_est(tm_, th_):
        h_p_ = _round_up(H, th_)
        return (2 * tm_ * c_in_p * x_it              # x row tile (dbl-buffered)
                + 2 * c_in_p * th_ * w_it            # w1 hidden tile
                + 2 * th_ * c_out_p * w_it           # w2 hidden tile
                + 2 * tm_ * c_out_p * o_it           # output tile
                + tm_ * c_out_p * 4                  # f32 accumulator
                + 2 * h_p_ * b1.dtype.itemsize       # resident b1
                + 2 * c_out_p * b2.dtype.itemsize)   # resident b2

    # Shrink the hidden tile first, then the row tile, until the budget fits.
    while vmem_est(tm_eff, th_eff) > budget and th_eff > 256:
        th_eff = max(256, th_eff // 2)
    while vmem_est(tm_eff, th_eff) > budget and tm_eff > 8 * sub:
        tm_eff = max(8 * sub, _round_up(tm_eff // 2, sub))
    # TODO(synk): add a C_out tile grid axis for very wide outputs on v7x so
    # the accumulator / output tiles stay bounded without shrinking tm.

    n_p = _round_up(N, tm_eff)
    h_p = _round_up(H, th_eff)
    n_ht = h_p // th_eff
    n_row_tiles = n_p // tm_eff

    # NOTE: in production, pad weights/biases once at parameter-setup time; here
    # padding is skipped entirely whenever dims are already aligned (the common
    # transformer case), so aligned shapes incur no extra HBM copies.
    x2d = x.reshape(N, C_in)
    if n_p != N or c_in_p != C_in:
        x2d = jnp.pad(x2d, ((0, n_p - N), (0, c_in_p - C_in)))
    w1p = w1 if (c_in_p == C_in and h_p == H) else jnp.pad(
        w1, ((0, c_in_p - C_in), (0, h_p - H)))
    w2p = w2 if (h_p == H and c_out_p == C_out) else jnp.pad(
        w2, ((0, h_p - H), (0, c_out_p - C_out)))
    b1p = (b1 if h_p == H else jnp.pad(b1, (0, h_p - H))).reshape(n_ht, th_eff)
    b2p = (b2 if c_out_p == C_out else jnp.pad(b2, (0, c_out_p - C_out))
           ).reshape(1, c_out_p)

    cost = pl.CostEstimate(
        flops=2 * N * C_in * H + 2 * N * H * C_out,
        transcendentals=N * H,
        bytes_accessed=(n_p * c_in_p * x_it + n_p * c_out_p * o_it
                        + n_row_tiles * (c_in_p * h_p + h_p * c_out_p) * w_it
                        + h_p * b1.dtype.itemsize + c_out_p * b2.dtype.itemsize))

    vmem_limit = min(int(vmem_cap * 0.85),
                     max(32 * 1024 * 1024,
                         vmem_est(tm_eff, th_eff) + (8 << 20)))

    out2d = pl.pallas_call(
        _mlp_kernel,
        out_shape=jax.ShapeDtypeStruct((n_p, c_out_p), x.dtype),
        grid_spec=pltpu.PrefetchScalarGridSpec(
            num_scalar_prefetch=0,
            grid=(n_row_tiles, n_ht),            # rows (parallel), hidden (reduction last)
            in_specs=[
                pl.BlockSpec((tm_eff, c_in_p), lambda i, h: (i, 0)),   # x row tile (resident over h)
                pl.BlockSpec((c_in_p, th_eff), lambda i, h: (0, h)),   # w1 hidden tile
                pl.BlockSpec((n_ht, th_eff), lambda i, h: (0, 0)),     # b1, fully resident
                pl.BlockSpec((th_eff, c_out_p), lambda i, h: (h, 0)),  # w2 hidden tile
                pl.BlockSpec((1, c_out_p), lambda i, h: (0, 0)),       # b2, fully resident
            ],
            out_specs=pl.BlockSpec((tm_eff, c_out_p), lambda i, h: (i, 0)),
            scratch_shapes=[pltpu.VMEM((tm_eff, c_out_p), jnp.float32)],
        ),
        compiler_params=pltpu.CompilerParams(
            dimension_semantics=("parallel", "arbitrary"),
            vmem_limit_bytes=vmem_limit,
        ),
        cost_estimate=cost,
    )(x2d, w1p, b1p, w2p, b2p)

    if n_p != N or c_out_p != C_out:
        out2d = out2d[:N, :C_out]
    return out2d.reshape(B, S, C_out)


def _mlp_reference(x, w1, b1, w2, b2):
    h = jnp.einsum("bsc,ch->bsh", x, w1) + b1
    h = jax.nn.gelu(h, approximate=False)
    return jnp.einsum("bsh,ho->bso", h, w2) + b2


if __name__ == "__main__":
    # Small shapes consistent with the module: batch=2, seq=8,
    # in_features=32, hidden_features=64, out_features=32.
    B, S, C_in, H, C_out = 2, 8, 32, 64, 32

    key = jax.random.PRNGKey(0)
    kx, kw1, kb1, kw2, kb2 = jax.random.split(key, 5)

    x = jax.random.normal(kx, (B, S, C_in), dtype=jnp.float32)
    # Deterministic synthetic parameters (nn.Linear weights stored as [in, out]).
    w1 = jax.random.normal(kw1, (C_in, H), dtype=jnp.float32) * 0.05
    b1 = jax.random.normal(kb1, (H,), dtype=jnp.float32) * 0.01
    w2 = jax.random.normal(kw2, (H, C_out), dtype=jnp.float32) * 0.05
    b2 = jax.random.normal(kb2, (C_out,), dtype=jnp.float32) * 0.01

    out = jax.block_until_ready(mlp_pallas(x, w1, b1, w2, b2))

    ref = _mlp_reference(x, w1, b1, w2, b2)
    assert out.shape == (B, S, C_out)
    assert jnp.allclose(out, ref, atol=1e-5, rtol=1e-5), float(
        jnp.max(jnp.abs(out - ref)))

    print("KERNEL_OK")
</pallas_src>

<mosaic_0001>
module attributes {stable_mosaic.version = 11 : i64} {
  func.func @_mlp_kernel(%arg0: i32, %arg1: i32, %arg2: memref<16x128xf32, #tpu.memory_space<vmem>>, %arg3: memref<128x128xf32, #tpu.memory_space<vmem>>, %arg4: memref<1x128xf32, #tpu.memory_space<vmem>>, %arg5: memref<128x128xf32, #tpu.memory_space<vmem>>, %arg6: memref<1x128xf32, #tpu.memory_space<vmem>>, %arg7: memref<16x128xf32, #tpu.memory_space<vmem>>, %arg8: memref<16x128xf32, #tpu.memory_space<vmem>>) attributes {dimension_semantics = [#tpu.dimension_semantics<parallel>, #tpu.dimension_semantics<arbitrary>], iteration_bounds = array<i64: 1, 1>, scalar_prefetch = 0 : i64, scratch_operands = 1 : i64, tpu.core_type = #tpu.core_type<tc>, window_params = [{transform_indices = @transform_0, window_bounds = array<i64: 16, 128>}, {transform_indices = @transform_1, window_bounds = array<i64: 128, 128>}, {pipeline_mode = #tpu.pipeline_mode<synchronous>, transform_indices = @transform_2, window_bounds = array<i64: 1, 128>}, {transform_indices = @transform_3, window_bounds = array<i64: 128, 128>}, {pipeline_mode = #tpu.pipeline_mode<synchronous>, transform_indices = @transform_4, window_bounds = array<i64: 1, 128>}, {transform_indices = @transform_5, window_bounds = array<i64: 16, 128>}]} {
    %c0_i32 = arith.constant 0 : i32
    %0 = arith.cmpi eq, %arg1, %c0_i32 : i32
    %1 = arith.extui %0 : i1 to i32
    %c0_i32_0 = arith.constant 0 : i32
    %2 = arith.cmpi ne, %1, %c0_i32_0 : i32
    scf.if %2 {
      %cst_17 = arith.constant 0.000000e+00 : f32
      %26 = vector.broadcast %cst_17 : f32 to vector<16x128xf32>
      %c0_18 = arith.constant 0 : index
      %c0_19 = arith.constant 0 : index
      %27 = vector.load %arg8[%c0_18, %c0_19] : memref<16x128xf32, #tpu.memory_space<vmem>>, vector<16x128xf32>
      tpu.vector_store %arg8[%c0_18, %c0_19], %26 {strides = array<i32>} : memref<16x128xf32, #tpu.memory_space<vmem>>, vector<16x128xf32>,
    } else {
    }
    %c0 = arith.constant 0 : index
    %c0_1 = arith.constant 0 : index
    %3 = vector.load %arg2[%c0, %c0_1] : memref<16x128xf32, #tpu.memory_space<vmem>>, vector<16x128xf32>
    %c0_2 = arith.constant 0 : index
    %c0_3 = arith.constant 0 : index
    %4 = vector.load %arg3[%c0_2, %c0_3] : memref<128x128xf32, #tpu.memory_space<vmem>>, vector<128x128xf32>
    %cst = arith.constant dense<0.000000e+00> : vector<16x128xf32>
    %5 = tpu.matmul %3, %4, %cst {dimension_numbers = #tpu.dot_dimension_numbers<[1], [0], [0], [1], [0, 0, 1, 1], [], []>} : vector<16x128xf32>, vector<128x128xf32>, vector<16x128xf32> -> vector<16x128xf32>
    %6 = arith.index_cast %arg1 : i32 to index
    %c0_4 = arith.constant 0 : index
    %7 = vector.load %arg4[%6, %c0_4] : memref<1x128xf32, #tpu.memory_space<vmem>>, vector<1x128xf32>
    %8 = vector.broadcast %7 : vector<1x128xf32> to vector<16x128xf32>
    %9 = arith.addf %5, %8 : vector<16x128xf32>
    %cst_5 = arith.constant 5.000000e-01 : f32
    %10 = vector.broadcast %cst_5 : f32 to vector<16x128xf32>
    %11 = arith.mulf %10, %9 : vector<16x128xf32>
    %cst_6 = arith.constant 0.707106769 : f32
    %12 = vector.broadcast %cst_6 : f32 to vector<16x128xf32>
    %13 = arith.mulf %9, %12 : vector<16x128xf32>
    %14 = math.erf %13 : vector<16x128xf32>
    %cst_7 = arith.constant 1.000000e+00 : f32
    %15 = vector.broadcast %cst_7 : f32 to vector<16x128xf32>
    %16 = arith.addf %15, %14 : vector<16x128xf32>
    %17 = arith.mulf %11, %16 : vector<16x128xf32>
    %c0_8 = arith.constant 0 : index
    %c0_9 = arith.constant 0 : index
    %18 = vector.load %arg8[%c0_8, %c0_9] : memref<16x128xf32, #tpu.memory_space<vmem>>, vector<16x128xf32>
    %c0_10 = arith.constant 0 : index
    %c0_11 = arith.constant 0 : index
    %19 = vector.load %arg5[%c0_10, %c0_11] : memref<128x128xf32, #tpu.memory_space<vmem>>, vector<128x128xf32>
    %cst_12 = arith.constant dense<0.000000e+00> : vector<16x128xf32>
    %20 = tpu.matmul %17, %19, %cst_12 {dimension_numbers = #tpu.dot_dimension_numbers<[1], [0], [0], [1], [0, 0, 1, 1], [], []>} : vector<16x128xf32>, vector<128x128xf32>, vector<16x128xf32> -> vector<16x128xf32>
    %21 = arith.addf %18, %20 : vector<16x128xf32>
    %c0_13 = arith.constant 0 : index
    %c0_14 = arith.constant 0 : index
    %22 = vector.load %arg8[%c0_13, %c0_14] : memref<16x128xf32, #tpu.memory_space<vmem>>, vector<16x128xf32>
    tpu.vector_store %arg8[%c0_13, %c0_14], %21 {strides = array<i32>} : memref<16x128xf32, #tpu.memory_space<vmem>>, vector<16x128xf32>,
    %c0_i32_15 = arith.constant 0 : i32
    %23 = arith.cmpi eq, %arg1, %c0_i32_15 : i32
    %24 = arith.extui %23 : i1 to i32
    %c0_i32_16 = arith.constant 0 : i32
    %25 = arith.cmpi ne, %24, %c0_i32_16 : i32
    scf.if %25 {
      %c0_17 = arith.constant 0 : index
      %c0_18 = arith.constant 0 : index
      %26 = vector.load %arg8[%c0_17, %c0_18] : memref<16x128xf32, #tpu.memory_space<vmem>>, vector<16x128xf32>
      %c0_19 = arith.constant 0 : index
      %c0_20 = arith.constant 0 : index
      %27 = vector.load %arg6[%c0_19, %c0_20] : memref<1x128xf32, #tpu.memory_space<vmem>>, vector<1x128xf32>
      %28 = vector.broadcast %27 : vector<1x128xf32> to vector<16x128xf32>
      %29 = arith.addf %26, %28 : vector<16x128xf32>
      %c0_21 = arith.constant 0 : index
      %c0_22 = arith.constant 0 : index
      %30 = vector.load %arg7[%c0_21, %c0_22] : memref<16x128xf32, #tpu.memory_space<vmem>>, vector<16x128xf32>
      tpu.vector_store %arg7[%c0_21, %c0_22], %29 {strides = array<i32>} : memref<16x128xf32, #tpu.memory_space<vmem>>, vector<16x128xf32>,
    } else {
    }
    return
  }
  func.func @transform_0(%arg0: i32, %arg1: i32) -> (i32, i32) {
    %c0_i32 = arith.constant 0 : i32
    %c0_i32_0 = arith.constant 0 : i32
    return %arg0, %c0_i32 : i32, i32
  }
  func.func @transform_1(%arg0: i32, %arg1: i32) -> (i32, i32) {
    %c0_i32 = arith.constant 0 : i32
    %c0_i32_0 = arith.constant 0 : i32
    return %c0_i32, %arg1 : i32, i32
  }
  func.func @transform_2(%arg0: i32, %arg1: i32) -> (i32, i32) {
    %c0_i32 = arith.constant 0 : i32
    %c0_i32_0 = arith.constant 0 : i32
    %c0_i32_1 = arith.constant 0 : i32
    return %c0_i32, %c0_i32_0 : i32, i32
  }
  func.func @transform_3(%arg0: i32, %arg1: i32) -> (i32, i32) {
    %c0_i32 = arith.constant 0 : i32
    %c0_i32_0 = arith.constant 0 : i32
    return %arg1, %c0_i32 : i32, i32
  }
  func.func @transform_4(%arg0: i32, %arg1: i32) -> (i32, i32) {
    %c0_i32 = arith.constant 0 : i32
    %c0_i32_0 = arith.constant 0 : i32
    %c0_i32_1 = arith.constant 0 : i32
    return %c0_i32, %c0_i32_0 : i32, i32
  }
  func.func @transform_5(%arg0: i32, %arg1: i32) -> (i32, i32) {
    %c0_i32 = arith.constant 0 : i32
    %c0_i32_0 = arith.constant 0 : i32
    return %arg0, %c0_i32 : i32, i32
  }
}

</mosaic_0001>

<bundles_post_ra>
// kernel: mlp_pallas.1
= control target key start
LH: loop header
LB: loop body
LE: loop exit
PB: predicated region body
PF: predicated region fallthrough
CT: control target
= control target key end

     0   :  { %s435_s1 = inlined_call_operand.vmem [shape: f32[128,128], index: 1, kind: input, shape index: {}]   ;;  %s436_s2 = inlined_call_operand.vmem [shape: f32[1,128], index: 2, kind: input, shape index: {}]   ;;  %s437_s0 = inlined_call_operand.vmem [shape: f32[16,128], index: 0, kind: input, shape index: {}]   ;;  %s438_s4 = inlined_call_operand.vmem [shape: f32[1,128], index: 4, kind: input, shape index: {}]   ;;  %s439_s3 = inlined_call_operand.vmem [shape: f32[128,128], index: 3, kind: input, shape index: {}]   ;;  %s440_s5 = inlined_call_operand.vmem [shape: f32[16,128], index: 5, kind: output, shape index: {}]  }
   0x1   :  { %v43_v0 = vld [vmem:[%s435_s1 + $0x78] sm:$0xff]  ;;  %v42_v1 = vld [vmem:[%s435_s1 + $0x70] sm:$0xff]  ;;  %v41_v2 = vld [vmem:[%s435_s1 + $0x68] sm:$0xff] }
   0x2   :  { %48 = vmatpush.msra.mxu0 %v43_v0  ;;  %223 = vmatpush.msra.mxu2 %v43_v0  ;;  %v40_v3 = vld [vmem:[%s435_s1 + $0x60] sm:$0xff]  ;;  %v39_v4 = vld [vmem:[%s435_s1 + $0x58] sm:$0xff]  ;;  %v38_v5 = vld [vmem:[%s435_s1 + $0x50] sm:$0xff] }
   0x3   :  { %v37_v6 = vld [vmem:[%s435_s1 + $0x48] sm:$0xff]  ;;  %v36_v7 = vld [vmem:[%s435_s1 + $0x40] sm:$0xff]  ;;  %v35_v8 = vld [vmem:[%s435_s1 + $0x38] sm:$0xff] }
   0x4   :  { %49 = vmatpush.msra.mxu0 %v42_v1  ;;  %224 = vmatpush.msra.mxu2 %v42_v1  ;;  %v34_v9 = vld [vmem:[%s435_s1 + $0x30] sm:$0xff]  ;;  %v33_v10 = vld [vmem:[%s435_s1 + $0x28] sm:$0xff]  ;;  %v32_v11 = vld [vmem:[%s435_s1 + $0x20] sm:$0xff] }
   0x5   :  { %v31_v12 = vld [vmem:[%s435_s1 + $0x18] sm:$0xff]  ;;  %v30_v13 = vld [vmem:[%s435_s1 + $0x10] sm:$0xff]  ;;  %v29_v14 = vld [vmem:[%s435_s1 + $0x8] sm:$0xff] }
   0x6   :  { %50 = vmatpush.msra.mxu0 %v41_v2  ;;  %225 = vmatpush.msra.mxu2 %v41_v2  ;;  %v28_v15 = vld [vmem:[%s435_s1] sm:$0xff]  ;;  %v27_v17 = vld [vmem:[%s437_s0 + $0x8] sm:$0xff]  ;;  %v176_v18 = vld [vmem:[%s439_s3 + $0x78] sm:$0xff] }
   0x7   :  { %v26_v16 = vld [vmem:[%s437_s0] sm:$0xff]  ;;  %177 = vmatpush.msra.mxu1 %v176_v18  ;;  %239 = vmatpush.msra.mxu3 %v176_v18  ;;  %v175_v19 = vld [vmem:[%s439_s3 + $0x70] sm:$0xff]  ;;  %v174_v20 = vld [vmem:[%s439_s3 + $0x68] sm:$0xff] }
   0x8   :  { %51 = vmatpush.msra.mxu0 %v40_v3  ;;  %226 = vmatpush.msra.mxu2 %v40_v3  ;;  %v173_v21 = vld [vmem:[%s439_s3 + $0x60] sm:$0xff]  ;;  %v172_v23 = vld [vmem:[%s439_s3 + $0x58] sm:$0xff]  ;;  %v171_v25 = vld [vmem:[%s439_s3 + $0x50] sm:$0xff] }
   0x9   :  { %178 = vmatpush.msra.mxu1 %v175_v19  ;;  %240 = vmatpush.msra.mxu3 %v175_v19  ;;  %v255_v22 = vld [vmem:[%s436_s2] ss:$0 sm:$0xff]  ;;  %v170_v27 = vld [vmem:[%s439_s3 + $0x48] sm:$0xff]  ;;  %v168_v30 = vld [vmem:[%s439_s3 + $0x38] sm:$0xff] }
   0xa   :  { %52 = vmatpush.msra.mxu0 %v39_v4  ;;  %227 = vmatpush.msra.mxu2 %v39_v4  ;;  %v169_v29 = vld [vmem:[%s439_s3 + $0x40] sm:$0xff]  ;;  %v167_v33 = vld [vmem:[%s439_s3 + $0x30] sm:$0xff]  ;;  %v166_v36 = vld [vmem:[%s439_s3 + $0x28] sm:$0xff] }
   0xb   :  { %179 = vmatpush.msra.mxu1 %v174_v20  ;;  %241 = vmatpush.msra.mxu3 %v174_v20  ;;  %v165_v39 = vld [vmem:[%s439_s3 + $0x20] sm:$0xff]  ;;  %v164_v43 = vld [vmem:[%s439_s3 + $0x18] sm:$0xff]  ;;  %v163_v47 = vld [vmem:[%s439_s3 + $0x10] sm:$0xff] }
   0xc   :  { %53 = vmatpush.msra.mxu0 %v38_v5  ;;  %228 = vmatpush.msra.mxu2 %v38_v5  ;;  %v162_v52 = vld [vmem:[%s439_s3 + $0x8] sm:$0xff]  ;;  %v161_v56 = vld [vmem:[%s439_s3] sm:$0xff] }
   0xd   :  { %180 = vmatpush.msra.mxu1 %v173_v21  ;;  %242 = vmatpush.msra.mxu3 %v173_v21 }
   0xe   :  { %54 = vmatpush.msra.mxu0 %v37_v6  ;;  %229 = vmatpush.msra.mxu2 %v37_v6 }
   0xf   :  { %181 = vmatpush.msra.mxu1 %v172_v23  ;;  %243 = vmatpush.msra.mxu3 %v172_v23 }
  0x10   :  { %55 = vmatpush.msra.mxu0 %v36_v7  ;;  %230 = vmatpush.msra.mxu2 %v36_v7 }
  0x11   :  { %182 = vmatpush.msra.mxu1 %v171_v25  ;;  %244 = vmatpush.msra.mxu3 %v171_v25 }
  0x12   :  { %56 = vmatpush.msra.mxu0 %v35_v8  ;;  %231 = vmatpush.msra.mxu2 %v35_v8 }
  0x13   :  { %183 = vmatpush.msra.mxu1 %v170_v27  ;;  %245 = vmatpush.msra.mxu3 %v170_v27 }
  0x14   :  { %57 = vmatpush.msra.mxu0 %v34_v9  ;;  %232 = vmatpush.msra.mxu2 %v34_v9 }
  0x15   :  { %184 = vmatpush.msra.mxu1 %v169_v29  ;;  %246 = vmatpush.msra.mxu3 %v169_v29 }
  0x16   :  { %58 = vmatpush.msra.mxu0 %v33_v10  ;;  %233 = vmatpush.msra.mxu2 %v33_v10 }
  0x17   :  { %185 = vmatpush.msra.mxu1 %v168_v30  ;;  %247 = vmatpush.msra.mxu3 %v168_v30 }
  0x18   :  { %59 = vmatpush.msra.mxu0 %v32_v11  ;;  %234 = vmatpush.msra.mxu2 %v32_v11 }
  0x19   :  { %186 = vmatpush.msra.mxu1 %v167_v33  ;;  %248 = vmatpush.msra.mxu3 %v167_v33 }
  0x1a   :  { %60 = vmatpush.msra.mxu0 %v31_v12  ;;  %235 = vmatpush.msra.mxu2 %v31_v12 }
  0x1b   :  { %187 = vmatpush.msra.mxu1 %v166_v36  ;;  %249 = vmatpush.msra.mxu3 %v166_v36 }
  0x1c   :  { %61 = vmatpush.msra.mxu0 %v30_v13  ;;  %236 = vmatpush.msra.mxu2 %v30_v13 }
  0x1d   :  { %188 = vmatpush.msra.mxu1 %v165_v39  ;;  %250 = vmatpush.msra.mxu3 %v165_v39 }
  0x1e   :  { %62 = vmatpush.msra.mxu0 %v29_v14  ;;  %237 = vmatpush.msra.mxu2 %v29_v14 }
  0x1f   :  { %189 = vmatpush.msra.mxu1 %v164_v43  ;;  %251 = vmatpush.msra.mxu3 %v164_v43 }
  0x20   :  { %63 = vmatpush.msra.mxu0 %v28_v15  ;;  %238 = vmatpush.msra.mxu2 %v28_v15 }
  0x21   :  { %64 = vmatmul.f32.vlgmr.msra.gmra.mxu0 %v26_v16  ;;  %67 = vmatmul.f32.vlgmr.msra.gmra.mxu2 %v27_v17 }
  0x22   :  { %190 = vmatpush.msra.mxu1 %v163_v47  ;;  %252 = vmatpush.msra.mxu3 %v163_v47 }
  0x24   :  { %191 = vmatpush.msra.mxu1 %v162_v52  ;;  %253 = vmatpush.msra.mxu3 %v162_v52 }
  0x26   :  { %192 = vmatpush.msra.mxu1 %v161_v56  ;;  %254 = vmatpush.msra.mxu3 %v161_v56  ;;  %v256_v56 = vld [vmem:[%s438_s4] ss:$0 sm:$0xff] }
  0x9e   :  { %v65_v24 = vpop.f32.mrf.mxu0 }
  0x9f   :  { %v366_v26 = vadd.f32 %v255_v22, %v65_v24 }
  0xa1   :  { %v372_v28 = vmul.f32 0.70710677, %v366_v26  ;;  %v71_v47 = vmul.f32 0.5, %v366_v26 }
  0xa3   :  { %v75_v31 = vmul.f32 %v372_v28, %v372_v28 }
  0xa4   :  { %v68_v32 = vpop.f32.mrf.mxu2 }
  0xa5   :  { %v385_v34 = vmin.f32 %v75_v31, 16.0  ;;  %v387_v35 = vadd.f32 %v255_v22, %v68_v32 }
  0xa7   :  { %v77_v37 = vmul.f32 2.1237322e-06, %v385_v34  ;;  %v394_v38 = vmul.f32 0.70710677, %v387_v35  ;;  %v88_v40 = vmul.f32 3.8918573e-05, %v385_v34 }
  0xa9   :  { %v78_v41 = vadd.f32 0.00028619796, %v77_v37  ;;  %v115_v42 = vmul.f32 %v394_v38, %v394_v38  ;;  %v89_v44 = vadd.f32 0.001143296, %v88_v40 }
  0xab   :  { %v79_v45 = vmul.f32 %v78_v41, %v385_v34  ;;  %v116_v46 = vmin.f32 %v115_v42, 16.0  ;;  %v90_v48 = vmul.f32 %v89_v44, %v385_v34 }
  0xad   :  { %v117_v49 = vmul.f32 2.1237322e-06, %v116_v46  ;;  %v128_v50 = vmul.f32 3.8918573e-05, %v116_v46  ;;  %v80_v51 = vadd.f32 0.0036580483, %v79_v45 }
  0xae   :  { %v91_v53 = vadd.f32 0.014752088, %v90_v48 }
  0xaf   :  { %v118_v54 = vadd.f32 0.00028619796, %v117_v49  ;;  %v129_v55 = vadd.f32 0.001143296, %v128_v50  ;;  %v81_v60 = vmul.f32 %v80_v51, %v385_v34 }
  0xb0   :  { %v92_v57 = vmul.f32 %v91_v53, %v385_v34  ;;  %v72_v53 = vmul.f32 0.5, %v387_v35 }
  0xb1   :  { %v119_v58 = vmul.f32 %v118_v54, %v116_v46  ;;  %v130_v59 = vmul.f32 %v129_v55, %v116_v46  ;;  %v82_v2 = vadd.f32 0.05243302, %v81_v60 }
  0xb2   :  { %v93_v61 = vadd.f32 0.112945676, %v92_v57 }
  0xb3   :  { %v120_v62 = vadd.f32 0.0036580483, %v119_v58  ;;  %v131_v63 = vadd.f32 0.014752088, %v130_v59  ;;  %v83_v8 = vmul.f32 %v82_v2, %v385_v34 }
  0xb4   :  { %v94_v0 = vmul.f32 %v93_v61, %v385_v34 }
  0xb5   :  { %v132_v1 = vmul.f32 %v131_v63, %v116_v46  ;;  %v121_v4 = vmul.f32 %v120_v62, %v116_v46  ;;  %v84_v13 = vadd.f32 0.18741608, %v83_v8 }
  0xb6   :  { %v95_v3 = vadd.f32 0.4994258, %v94_v0 }
  0xb7   :  { %v133_v5 = vadd.f32 0.112945676, %v132_v1  ;;  %v122_v10 = vadd.f32 0.05243302, %v121_v4  ;;  %v85_v17 = vmul.f32 %v84_v13, %v385_v34 }
  0xb8   :  { %v96_v6 = vmul.f32 %v95_v3, %v385_v34 }
  0xb9   :  { %v134_v7 = vmul.f32 %v133_v5, %v116_v46  ;;  %v123_v14 = vmul.f32 %v122_v10, %v116_v46  ;;  %v86_v21 = vadd.f32 1.1283791, %v85_v17 }
  0xba   :  { %v97_v9 = vadd.f32 1.0, %v96_v6 }
  0xbb   :  { %v135_v11 = vadd.f32 0.4994258, %v134_v7  ;;  %v124_v18 = vadd.f32 0.18741608, %v123_v14  ;;  %v87_v31 = vmul.f32 %v86_v21, %v372_v28 }
  0xbc   :  { %257 = vrcp.f32 %v97_v9  ;;  %v109_v22 = vand.u32 2147483648, %v97_v9  ;;  %v107_v27 = vand.u32 2147483647, %v97_v9  ;;  %vm103_vm1 = vweird.f32 %v97_v9 }
  0xbd   :  { %v136_v12 = vmul.f32 %v135_v11, %v116_v46  ;;  %v125_v24 = vmul.f32 %v124_v18, %v116_v46 }
  0xbe   :  { %v110_v32 = vor.u32 1.1754944e-38, %v109_v22  ;;  %vm108_vm3 = vcmp.eq.f32.partialorder %v107_v27, 8.507059e+37 }
  0xbf   :  { %v137_v15 = vadd.f32 1.0, %v136_v12  ;;  %v126_v36 = vadd.f32 1.1283791, %v125_v24 }
  0xc1   :  { %259 = vrcp.f32 %v137_v15  ;;  %v149_v37 = vand.u32 2147483648, %v137_v15  ;;  %v147_v41 = vand.u32 2147483647, %v137_v15  ;;  %vm143_vm5 = vweird.f32 %v137_v15 }
  0xc2   :  { %v258_v16 = vpop.eup %257  ;;  %v127_v46 = vmul.f32 %v126_v36, %v394_v38 }
  0xc3   :  { %v99_v19 = vmul.f32 %v258_v16, %v97_v9  ;;  %vm104_vm0 = vweird.f32 %v258_v16  ;;  %v150_v45 = vor.u32 1.1754944e-38, %v149_v37  ;;  %vm148_vm7 = vcmp.eq.f32.partialorder %v147_v41, 8.507059e+37 }
  0xc4   :  { %vm105_vm2 = vmor %vm103_vm1, %vm104_vm0 }
  0xc5   :  { %v100_v20 = vsub.f32 1.0, %v99_v19 }
  0xc7   :  { %v260_v23 = vpop.eup %259  ;;  %v101_v25 = vmul.f32 %v258_v16, %v100_v20 }
  0xc8   :  { %v139_v29 = vmul.f32 %v260_v23, %v137_v15  ;;  %vm144_vm4 = vweird.f32 %v260_v23 }
  0xc9   :  { %v102_v30 = vadd.f32 %v258_v16, %v101_v25  ;;  %vm145_vm6 = vmor %vm143_vm5, %vm144_vm4 }
  0xca   :  { %v140_v33 = vsub.f32 1.0, %v139_v29 }
  0xcb   :  { %v106_v34 = vsel %vm105_vm2, %v258_v16, %v102_v30 }
  0xcc   :  { %v111_v39 = vsel %vm108_vm3, %v110_v32, %v106_v34  ;;  %v141_v40 = vmul.f32 %v260_v23, %v140_v33 }
  0xcd   :  { %v112_v42 = vmul.f32 %v111_v39, %v87_v31 }
  0xce   :  { %v142_v43 = vadd.f32 %v260_v23, %v141_v40 }
  0xcf   :  { %v221_v44 = vclamps-f32 %v112_v42, 1.0 }
  0xd0   :  { %v146_v28 = vsel %vm145_vm6, %v260_v23, %v142_v43 }
  0xd1   :  { %v155_v48 = vadd.f32 1.0, %v221_v44  ;;  %v151_v49 = vsel %vm148_vm7, %v150_v45, %v146_v28 }
  0xd2   :  { %v152_v50 = vmul.f32 %v151_v49, %v127_v46 }
  0xd3   :  { %v157_v51 = vmul.f32 %v155_v48, %v71_v47 }
  0xd4   :  { %v222_v52 = vclamps-f32 %v152_v50, 1.0 }
  0xd5   :  { %193 = vmatmul.f32.vlgmr.msra.gmra.mxu1 %v157_v51 }
  0xd6   :  { %v156_v54 = vadd.f32 1.0, %v222_v52 }
  0xd8   :  { %v158_v55 = vmul.f32 %v156_v54, %v72_v53 }
  0xda   :  { %196 = vmatmul.f32.vlgmr.msra.gmra.mxu3 %v158_v55 }
 0x152   :  { %v194_v38 = vpop.f32.mrf.mxu1 }
 0x153   :  { %v213_v57 = vadd.f32 %v256_v56, %v194_v38 }
 0x155   :  { %215 = vst [vmem:[%s440_s5] sm:$0xff] %v213_v57 }
 0x15d   :  { %v197_v26 = vpop.f32.mrf.mxu3 }
 0x15e   :  { %v214_v58 = vadd.f32 %v256_v56, %v197_v26 }
 0x160   :  { %216 = vst [vmem:[%s440_s5 + $0x8] sm:$0xff] %v214_v58 }

</bundles_post_ra>
